<compile_context>
chip_gen: v7x
topology: tpu7x:2x2x1
jax: 0.10.0
libtpu: 0.0.40
codegen_flags: <defaults>
</compile_context>

<pallas_src>
import jax
import jax.numpy as jnp
from jax.experimental import pallas as pl
from jax.experimental.pallas import tpu as pltpu


def _out_proj_kernel(x_ref, w_ref, o_ref, acc_ref):
    # x_ref : (tm, head_dim)   activations for one head / one row tile
    # w_ref : (head_dim, tn)   matching head slice of the (transposed) weight
    # o_ref : (tm, tn)
    # acc_ref: (tm, tn) f32 accumulator, resident across the head axis
    h = pl.program_id(2)

    @pl.when(h == 0)
    def _():
        acc_ref[...] = jnp.zeros_like(acc_ref)

    acc_ref[...] += jnp.dot(
        x_ref[...], w_ref[...], preferred_element_type=jnp.float32
    )

    @pl.when(h == pl.num_programs(2) - 1)
    def _():
        o_ref[...] = acc_ref[...].astype(o_ref.dtype)


def _round_up(x, m):
    return ((x + m - 1) // m) * m


def _pick_row_tile(m, tm_max=256):
    """Row tile: multiple of 8 (sublane), capped at tm_max (MXU-native)."""
    m8 = _round_up(m, 8)
    if m8 <= tm_max:
        return m8, m8
    return tm_max, _round_up(m, tm_max)


def _pick_col_tile(n, tn_max=512):
    """Column tile: multiple of 128 (lane-dense stores), capped at tn_max."""
    n128 = _round_up(n, 128)
    if n128 <= tn_max:
        return n128, n128
    for t in (512, 384, 256, 128):
        if t <= tn_max and n128 % t == 0:
            return t, n128
    return 128, n128


def multihead_attention_out(attn_output, weight, num_heads, *, tm_max=256, tn_max=512):
    """attn_output: (bs*num_heads, seq, head_dim); weight: (d_model, d_model) as in nn.Linear."""
    bs_h, seq, head_dim = attn_output.shape
    bs = bs_h // num_heads
    assert bs * num_heads == bs_h
    d_model = num_heads * head_dim
    assert weight.shape == (d_model, d_model)

    M = bs * seq
    N = d_model

    tm, M_pad = _pick_row_tile(M, tm_max)
    tn, N_pad = _pick_col_tile(N, tn_max)

    # (H*bs, seq, hd) -> (H, bs*seq, hd): contiguous reshape, no data movement.
    x3 = attn_output.reshape(num_heads, M, head_dim)
    if M_pad != M:
        x3 = jnp.pad(x3, ((0, 0), (0, M_pad - M), (0, 0)))

    # Weight (d_out, d_in) -> per-head (H, head_dim, d_out_padded) so the
    # kernel computes plain (tm, hd) @ (hd, tn).  One-time O(d_model^2)
    # layout; constant-folded by XLA when the weight is a parameter.
    w = weight
    if N_pad != N:
        w = jnp.pad(w, ((0, N_pad - N), (0, 0)))
    w3 = jnp.transpose(w.reshape(N_pad, num_heads, head_dim), (1, 2, 0))

    grid = (M_pad // tm, N_pad // tn, num_heads)

    y = pl.pallas_call(
        _out_proj_kernel,
        out_shape=jax.ShapeDtypeStruct((M_pad, N_pad), attn_output.dtype),
        grid_spec=pltpu.PrefetchScalarGridSpec(
            num_scalar_prefetch=0,
            grid=grid,
            in_specs=[
                # activations for head h, row tile i: (tm, head_dim)
                pl.BlockSpec((None, tm, head_dim), lambda i, j, h: (h, i, 0)),
                # weight slice for head h, column tile j: (head_dim, tn)
                pl.BlockSpec((None, head_dim, tn), lambda i, j, h: (h, 0, j)),
            ],
            out_specs=pl.BlockSpec((tm, tn), lambda i, j, h: (i, j)),
            scratch_shapes=[pltpu.VMEM((tm, tn), jnp.float32)],
        ),
        compiler_params=pltpu.CompilerParams(
            dimension_semantics=("parallel", "parallel", "arbitrary"),
        ),
    )(x3, w3)

    return y[:M, :N].reshape(bs, seq, d_model)


def _xavier_uniform(key, shape, dtype=jnp.float32):
    fan_in, fan_out = shape[1], shape[0]
    limit = (6.0 / (fan_in + fan_out)) ** 0.5
    return jax.random.uniform(key, shape, dtype=dtype, minval=-limit, maxval=limit)


if __name__ == "__main__":

    def run_case(key, d_model, num_heads, bs, seq):
        head_dim = d_model // num_heads
        k_x, k_w = jax.random.split(key)

        attn_output = jax.random.normal(
            k_x, (bs * num_heads, seq, head_dim), dtype=jnp.float32
        )
        weight = _xavier_uniform(k_w, (d_model, d_model))

        out = multihead_attention_out(attn_output, weight, num_heads)
        out = jax.block_until_ready(out)

        # Reference: exactly the PyTorch forward semantics
        # (chunk over dim0 -> cat over dim2 -> x @ W.T), in plain JAX.
        x = attn_output.reshape(num_heads, bs, seq, head_dim)
        x = jnp.transpose(x, (1, 2, 0, 3)).reshape(bs, seq, d_model)
        ref = jnp.matmul(x, weight.T, precision=jax.lax.Precision.HIGHEST)

        assert out.shape == (bs, seq, d_model)
        assert jnp.allclose(out, ref, atol=1e-4, rtol=1e-4), float(
            jnp.max(jnp.abs(out - ref))
        )

    key = jax.random.PRNGKey(0)
    k1, k2 = jax.random.split(key)

    # Small shape consistent with the module: d_model=32, heads=4, bs=2, seq=8.
    run_case(k1, d_model=32, num_heads=4, bs=2, seq=8)
    # Exercise the padding paths (M not a multiple of 8, d_model padded to 128).
    run_case(k2, d_model=64, num_heads=2, bs=3, seq=5)

    print("KERNEL_OK")
</pallas_src>

<mosaic_0001>
module attributes {stable_mosaic.version = 11 : i64} {
  func.func @_out_proj_kernel(%arg0: i32, %arg1: i32, %arg2: i32, %arg3: memref<1x16x8xf32, #tpu.memory_space<vmem>>, %arg4: memref<1x8x128xf32, #tpu.memory_space<vmem>>, %arg5: memref<16x128xf32, #tpu.memory_space<vmem>>, %arg6: memref<16x128xf32, #tpu.memory_space<vmem>>) attributes {dimension_semantics = [#tpu.dimension_semantics<parallel>, #tpu.dimension_semantics<parallel>, #tpu.dimension_semantics<arbitrary>], iteration_bounds = array<i64: 1, 1, 4>, scalar_prefetch = 0 : i64, scratch_operands = 1 : i64, tpu.core_type = #tpu.core_type<tc>, window_params = [{transform_indices = @transform_0, window_bounds = array<i64: 1, 16, 8>}, {transform_indices = @transform_1, window_bounds = array<i64: 1, 8, 128>}, {transform_indices = @transform_2, window_bounds = array<i64: 16, 128>}]} {
    %c0_i32 = arith.constant 0 : i32
    %0 = arith.cmpi eq, %arg2, %c0_i32 : i32
    %1 = arith.extui %0 : i1 to i32
    %c0_i32_0 = arith.constant 0 : i32
    %2 = arith.cmpi ne, %1, %c0_i32_0 : i32
    scf.if %2 {
      %cst_11 = arith.constant 0.000000e+00 : f32
      %14 = vector.broadcast %cst_11 : f32 to vector<16x128xf32>
      %c0_12 = arith.constant 0 : index
      %c0_13 = arith.constant 0 : index
      %15 = vector.load %arg6[%c0_12, %c0_13] : memref<16x128xf32, #tpu.memory_space<vmem>>, vector<16x128xf32>
      tpu.vector_store %arg6[%c0_12, %c0_13], %14 {strides = array<i32>} : memref<16x128xf32, #tpu.memory_space<vmem>>, vector<16x128xf32>,
    } else {
    }
    %c0 = arith.constant 0 : index
    %c0_1 = arith.constant 0 : index
    %3 = vector.load %arg6[%c0, %c0_1] : memref<16x128xf32, #tpu.memory_space<vmem>>, vector<16x128xf32>
    %c0_2 = arith.constant 0 : index
    %c0_3 = arith.constant 0 : index
    %c0_4 = arith.constant 0 : index
    %4 = vector.load %arg3[%c0_2, %c0_3, %c0_4] : memref<1x16x8xf32, #tpu.memory_space<vmem>>, vector<1x16x8xf32>
    %5 = vector.shape_cast %4 : vector<1x16x8xf32> to vector<16x8xf32>
    %c0_5 = arith.constant 0 : index
    %c0_6 = arith.constant 0 : index
    %c0_7 = arith.constant 0 : index
    %6 = vector.load %arg4[%c0_5, %c0_6, %c0_7] : memref<1x8x128xf32, #tpu.memory_space<vmem>>, vector<1x8x128xf32>
    %7 = vector.shape_cast %6 : vector<1x8x128xf32> to vector<8x128xf32>
    %cst = arith.constant dense<0.000000e+00> : vector<16x128xf32>
    %8 = tpu.matmul %5, %7, %cst {dimension_numbers = #tpu.dot_dimension_numbers<[1], [0], [0], [1], [0, 0, 1, 1], [], []>} : vector<16x8xf32>, vector<8x128xf32>, vector<16x128xf32> -> vector<16x128xf32>
    %9 = arith.addf %3, %8 : vector<16x128xf32>
    %c0_8 = arith.constant 0 : index
    %c0_9 = arith.constant 0 : index
    %10 = vector.load %arg6[%c0_8, %c0_9] : memref<16x128xf32, #tpu.memory_space<vmem>>, vector<16x128xf32>
    tpu.vector_store %arg6[%c0_8, %c0_9], %9 {strides = array<i32>} : memref<16x128xf32, #tpu.memory_space<vmem>>, vector<16x128xf32>,
    %c3_i32 = arith.constant 3 : i32
    %11 = arith.cmpi eq, %arg2, %c3_i32 : i32
    %12 = arith.extui %11 : i1 to i32
    %c0_i32_10 = arith.constant 0 : i32
    %13 = arith.cmpi ne, %12, %c0_i32_10 : i32
    scf.if %13 {
      %c0_11 = arith.constant 0 : index
      %c0_12 = arith.constant 0 : index
      %14 = vector.load %arg6[%c0_11, %c0_12] : memref<16x128xf32, #tpu.memory_space<vmem>>, vector<16x128xf32>
      %c0_13 = arith.constant 0 : index
      %c0_14 = arith.constant 0 : index
      %15 = vector.load %arg5[%c0_13, %c0_14] : memref<16x128xf32, #tpu.memory_space<vmem>>, vector<16x128xf32>
      tpu.vector_store %arg5[%c0_13, %c0_14], %14 {strides = array<i32>} : memref<16x128xf32, #tpu.memory_space<vmem>>, vector<16x128xf32>,
    } else {
    }
    return
  }
  func.func @transform_0(%arg0: i32, %arg1: i32, %arg2: i32) -> (i32, i32, i32) {
    %c0_i32 = arith.constant 0 : i32
    %c0_i32_0 = arith.constant 0 : i32
    return %arg2, %arg0, %c0_i32 : i32, i32, i32
  }
  func.func @transform_1(%arg0: i32, %arg1: i32, %arg2: i32) -> (i32, i32, i32) {
    %c0_i32 = arith.constant 0 : i32
    %c0_i32_0 = arith.constant 0 : i32
    return %arg2, %c0_i32, %arg1 : i32, i32, i32
  }
  func.func @transform_2(%arg0: i32, %arg1: i32, %arg2: i32) -> (i32, i32) {
    %c0_i32 = arith.constant 0 : i32
    return %arg0, %arg1 : i32, i32
  }
}

</mosaic_0001>

<bundles_post_ra>
// kernel: tpu_custom_call.1
= control target key start
LH: loop header
LB: loop body
LE: loop exit
PB: predicated region body
PF: predicated region fallthrough
CT: control target
= control target key end

     0   :  { %7 = vsyncpa [#allocation4], 0  ;;  %s526_s9 = smov 0   ;;  %s528_s10 = smov 0   ;;  %s594_s0 = inlined_call_operand.vmem [shape: f32[4,16,8], index: 0, kind: input, shape index: {}]   ;;  %s595_s1 = inlined_call_operand.vmem [shape: f32[4,8,128], index: 1, kind: input, shape index: {}]   ;;  %s596_s2 = inlined_call_operand.hbm [shape: f32[16,128], index: 2, kind: output, shape index: {}]  }
   0x1   :  { %s530_s11 = smov 0  }
   0x2 LB: > { %s395_s12 = sadd.s32 4294967295, %s505_s11   ;;  %s25_s13 = sadd.s32 1, %s501_s10  ;;  %s505_s11 = sphi %s530_s11, %s13_s11   ;;  %s501_s10 = sphi %s528_s10, %s599_s10   ;;  %s497_s9 = sphi %s526_s9, %s598_s9  }
   0x3   : > { %p26_p0 = scmp.ge.s32.totalorder %s25_s13, 4  ;;  %p398_p1 = scmp.ge.s32.totalorder %s505_s11, 1 }
   0x4   : > { %p155_p2 = scmp.lt.s32.totalorder %s505_s11, 5 }
   0x5   : > { %s601_s13 = smov (%p26_p0, %s25_s13), 0 }
   0x6   : > { %p156_p3 = pnand %p398_p1, %p155_p2 }
   0x7   : > { %p184_p4 = scmp.lt.s32.totalorder (!%p156_p3), %s497_s9, 3  ;;  %p402_p5 = scmp.ne.s32.totalorder (!%p156_p3), %s497_s9, 0 }
   0x8   : > { %159 = sbr.rel (%p156_p3) target bundleno = 276 (0x114), region = 28 }
   0xf   : > { %s185_s14 = scalar_select %p184_p4, %s497_s9, 3 }
  0x10   : > { %204 = sbr.rel (%p402_p5) target bundleno = 23 (0x17), region = 32  ;;  %v507_v0 = vmov (!%p402_p5), 0.0  }
  0x11   : > { %s410_s15 = sshll.u32 %s185_s14, 4  ;;  %s401_s16 = sshll.u32 %s185_s14, 3  ;;  %205 = vst [vmem:[#allocation2] sm:$0xff] (!%p402_p5), %v507_v0  ;;  %206 = vst [vmem:[#allocation2 + $0x8] sm:$0xff] (!%p402_p5), %v507_v0 }
  0x12   : > { %s191_s19 = scalar_lea.vmem %s594_s0, %s410_s15  ;;  %s199_s22 = scalar_lea.vmem %s595_s1, %s401_s16 }
  0x17 PF: > { %v211_v1 = vld [vmem:[%s199_s22] sm:$0xff]  ;;  %vm212_vm0 = vcmask 64512   ;;  %v210_v3 = vld [vmem:[%s191_s19 + $0x8] sm:$0xff]  ;;  %p405_p6 = scmp.ne.s32.totalorder %s497_s9, 3 }
  0x18   : > { %v209_v2 = vld [vmem:[%s191_s19] sm:$0xff]  ;;  %414 = vmatprep.subr.mxu0 %v211_v1  ;;  %v208_v4 = vld [vmem:[#allocation2 + $0x8] sm:$0xff] }
  0x19   : > { %416 = vmatprep.mubr.msk.f32.mxu0 %vm212_vm0, %v209_v2  ;;  %415 = vmatpush3.msra.mxu0 %v211_v1  ;;  %v207_v5 = vld [vmem:[#allocation2] sm:$0xff] }
  0x1a   : > { %417 = vmatmul.mubr.msk.f32.vlgmr.msra.gmra.mrb[0].mxu0 %vm212_vm0, %v210_v3 }
  0xeb   : > { %301 = sbr.rel (%p405_p6) target bundleno = 250 (0xfa), region = 36 }
  0xed   : > { %v418_v6 = vpop.f32.mrb[0].mxu0 }
  0xee   : > { %v295_v7 = vadd.f32 %v418_v6, %v208_v4  ;;  %v285_v8 = vpop.f32.mrb[1].mxu0 }
  0xef   : > { %v294_v9 = vadd.f32 %v285_v8, %v207_v5 }
  0xf0   : > { %297 = vst [vmem:[#allocation2 + $0x8] sm:$0xff] %v295_v7 }
  0xf1   : > { %296 = vst [vmem:[#allocation2] sm:$0xff] %v294_v9 }
  0xf7   : > { %v303_v11 = vld [vmem:[#allocation2 + $0x8] sm:$0xff] }
  0xf8   : > { %v302_v10 = vld [vmem:[#allocation2] sm:$0xff]  ;;  %305 = vst [vmem:[#allocation3 + $0x8] sm:$0xff] %v303_v11 }
  0xf9   : > { %304 = vst [vmem:[#allocation3] sm:$0xff] %v302_v10 }
  0xfa PF: > { %p559_p7 = scmp.eq.s32.totalorder %s395_s12, 3  ;;  %s508_s24 = smov [#allocation3]  }
  0xfb   : > { %s316_s25 = sshll.u32 %s508_s24, 4  ;;  %s317_s25 = int_to_ptr.vmem [resolvable:$true] %s316_s25 }
  0xfc   : > { %s453_s26 = scalar_lea.vmem %s317_s25, 256  ;;  %p460_p11 = scmp.lt.s32.totalorder %s317_s25, %s317_s25 }
  0xfd   : > { %p454_p8 = scmp.ne.s32.totalorder %s317_s25, %s453_s26  ;;  %p461_p12 = scmp.lt.s32.totalorder %s453_s26, %s453_s26 }
  0xff   : > { %p455_p9 = pnand %p454_p8, %p559_p7  ;;  %p462_p13 = por %p461_p12, %p460_p11 }
 0x101   : > { %p456_p10 = pneg %p455_p9 }
 0x103   : > { %p463_p0 = pnand %p462_p13, %p456_p10 }
 0x105   : > { %466 = shalt.err (!%p463_p0)
}
 0x106   : > { %s467_s29 = scalar_lea.hbm %s596_s2, 256 }
 0x107   : > { %p468_p1 = scmp.ne.s32.totalorder %s596_s2, %s467_s29  ;;  %p473_p4 = scmp.lt.u32.totalorder %s467_s29, %s596_s2 }
 0x109   : > { %p469_p2 = pnand %p468_p1, %p559_p7 }
 0x10b   : > { %p470_p3 = pneg %p469_p2 }
 0x10d   : > { %p475_p5 = pnand %p473_p4, %p470_p3 }
 0x10f   : > { %478 = shalt.err (!%p475_p5)
}
 0x110   : > { %s509_s6 = smov 128   ;;  %s510_s7 = smov 8  }
 0x111   : > { %420 = dma.vmem_to_hbm [thread:$0]  (%p559_p7), %s317_s25, 256, %s596_s2, [#allocation4], %s509_s6, %s509_s6, %s510_s7  }
 0x112   : > { %492 = dma.done.wait (%p559_p7), [#allocation4], 256  }
 0x113   : > { %494 = vsyncadd (%p559_p7), [#allocation4], 4294967040 }
 0x114 PF: > { %s13_s11 = sadd.s32 1, %s505_s11   ;;  %s598_s9 = smov %s501_s10 }
 0x115   : > { %p10_p6 = scmp.ge.s32.totalorder %s13_s11, 6   ;;  %s599_s10 = smov %s601_s13 }
 0x117   :  { %12 = sbr.rel (!%p10_p6) target bundleno = 2 (0x2), region = 67 }
 0x11e   :  { %332 = vsyncpa [#allocation4], 1 }
 0x11f   :  { %334 = vsyncpa [#allocation4 + $0x1], 1 }

</bundles_post_ra>
